<compile_context>
chip_gen: v7x
topology: tpu7x:2x2x1
jax: 0.10.0
libtpu: 0.0.40
codegen_flags: <defaults>
</compile_context>

<pallas_src>
import functools

import jax
import jax.numpy as jnp
from jax.experimental import pallas as pl
from jax.experimental.pallas import tpu as pltpu


def _round_up(x, m):
    return (x + m - 1) // m * m


def _bias_layout(inp_size, hidden_size, latent_size):
    """Lane-aligned (multiple-of-128) offsets for the packed bias slab."""
    widths = (hidden_size, hidden_size, hidden_size, 2 * latent_size,
              hidden_size, hidden_size, inp_size)
    offsets = []
    off = 0
    for w in widths:
        offsets.append(off)
        off += _round_up(w, 128)
    return tuple(offsets), off


def _cvae_kernel(
    # data (batch-blocked)
    xl_ref, eps_ref,
    # encoder / decoder weights (VMEM-resident, constant index_map)
    e_w1_ref, d_w1l_ref,
    e_w2_ref, e_w3_ref, e_wmv_ref,
    d_w1z_ref, d_w2_ref, d_w3_ref,
    # packed biases (1, 7*128)
    bias_ref,
    # single lane-dense output slab (bm, out_pad)
    out_ref,
    *, inp_size, hidden_size, latent_size, bias_offsets, out_pad,
):
    f32 = jnp.float32
    xl = xl_ref[...]      # [bm, INP+COND]  (x || label)
    eps = eps_ref[...]    # [bm, LAT]

    def bias(i, width):
        off = bias_offsets[i]           # static, multiple of 128 -> aligned slice
        return bias_ref[:, off:off + width]

    # ---------------- Encoder ----------------
    # Linear(inp+cond -> hidden) + ReLU (concat folded into the full weight).
    h = jnp.dot(xl, e_w1_ref[...], preferred_element_type=f32) + bias(0, hidden_size)
    h = jnp.maximum(h, 0.0)

    h = jnp.dot(h, e_w2_ref[...], preferred_element_type=f32) + bias(1, hidden_size)
    h = jnp.maximum(h, 0.0)

    # Dropout(0.3): identity in eval mode.
    h = jnp.dot(h, e_w3_ref[...], preferred_element_type=f32) + bias(2, hidden_size)
    h = jnp.maximum(h, 0.0)

    # Fused mean|var head: one (HID, 2*LAT) matmul, then static lane split.
    mv = jnp.dot(h, e_wmv_ref[...], preferred_element_type=f32) + bias(3, 2 * latent_size)
    mean = mv[:, :latent_size]
    var = mv[:, latent_size:]

    # ---------------- Reparameterize ----------------
    z = mean + eps * jnp.exp(0.5 * var)

    # ---------------- Decoder ----------------
    # cat(z, label) folded: z @ W1z  +  [x,label] @ W1l_pad  (x rows of W1l_pad are 0).
    d = (jnp.dot(z, d_w1z_ref[...], preferred_element_type=f32)
         + jnp.dot(xl, d_w1l_ref[...], preferred_element_type=f32)
         + bias(4, hidden_size))
    d = jnp.maximum(d, 0.0)

    d = jnp.dot(d, d_w2_ref[...], preferred_element_type=f32) + bias(5, hidden_size)
    d = jnp.maximum(d, 0.0)

    # Dropout(0.2): identity in eval mode.
    logits = jnp.dot(d, d_w3_ref[...], preferred_element_type=f32) + bias(6, inp_size)
    recon = jax.nn.sigmoid(logits)

    # Single lane-dense output slab: [recon | mean | var | z | zero-pad].
    pieces = [recon, mean, var, z]
    pad = out_pad - (inp_size + 3 * latent_size)
    if pad > 0:
        pieces.append(jnp.zeros((recon.shape[0], pad), f32))
    out_ref[...] = jnp.concatenate(pieces, axis=-1).astype(out_ref.dtype)


# ----------------------------- parameters ------------------------------------

def _linear_params(key, fan_in, fan_out):
    """PyTorch-style default Linear init, weight returned as (in, out)."""
    kw, kb = jax.random.split(key)
    bound = 1.0 / jnp.sqrt(float(fan_in))
    w = jax.random.uniform(kw, (fan_in, fan_out), jnp.float32, -bound, bound)
    b = jax.random.uniform(kb, (1, fan_out), jnp.float32, -bound, bound)
    return w, b


def init_cvae_params(key, inp_size, hidden_size, latent_size, condition_size):
    """Logical (un-packed) parameters, matching the PyTorch module layout."""
    keys = jax.random.split(key, 8)
    e_w1, e_b1 = _linear_params(keys[0], inp_size + condition_size, hidden_size)
    e_w2, e_b2 = _linear_params(keys[1], hidden_size, hidden_size)
    e_w3, e_b3 = _linear_params(keys[2], hidden_size, hidden_size)
    e_wm, e_bm = _linear_params(keys[3], hidden_size, latent_size)
    e_wv, e_bv = _linear_params(keys[4], hidden_size, latent_size)
    d_w1, d_b1 = _linear_params(keys[5], latent_size + condition_size, hidden_size)
    d_w2, d_b2 = _linear_params(keys[6], hidden_size, hidden_size)
    d_w3, d_b3 = _linear_params(keys[7], hidden_size, inp_size)
    return dict(
        e_w1=e_w1, e_b1=e_b1, e_w2=e_w2, e_b2=e_b2, e_w3=e_w3, e_b3=e_b3,
        e_wm=e_wm, e_bm=e_bm, e_wv=e_wv, e_bv=e_bv,
        d_w1=d_w1, d_b1=d_b1, d_w2=d_w2, d_b2=d_b2, d_w3=d_w3, d_b3=d_b3,
    )


def pack_cvae_params(lp, inp_size, hidden_size, latent_size, condition_size):
    """Pack logical params into the kernel-friendly layout."""
    offsets, total = _bias_layout(inp_size, hidden_size, latent_size)

    # Fused mean|var head.
    e_wmv = jnp.concatenate([lp["e_wm"], lp["e_wv"]], axis=1)
    b_mv = jnp.concatenate([lp["e_bm"], lp["e_bv"]], axis=1)

    # Decoder first layer split; label part zero-padded to (INP+COND, HID) so the
    # kernel can apply it to the already-concatenated [x,label] input.
    d_w1z = lp["d_w1"][:latent_size]
    d_w1l = lp["d_w1"][latent_size:]
    d_w1l_pad = jnp.zeros((inp_size + condition_size, hidden_size), jnp.float32)
    d_w1l_pad = d_w1l_pad.at[inp_size:].set(d_w1l)

    # One lane-aligned packed bias slab.
    biases = (lp["e_b1"], lp["e_b2"], lp["e_b3"], b_mv,
              lp["d_b1"], lp["d_b2"], lp["d_b3"])
    bias_pack = jnp.zeros((1, total), jnp.float32)
    for off, bvec in zip(offsets, biases):
        bias_pack = bias_pack.at[:, off:off + bvec.shape[-1]].set(bvec)

    return dict(
        e_w1=lp["e_w1"], d_w1l_pad=d_w1l_pad,
        e_w2=lp["e_w2"], e_w3=lp["e_w3"], e_wmv=e_wmv,
        d_w1z=d_w1z, d_w2=lp["d_w2"], d_w3=lp["d_w3"],
        bias_pack=bias_pack,
    )


# ------------------------------- forward -------------------------------------

@functools.partial(
    jax.jit,
    static_argnames=("inp_size", "hidden_size", "latent_size", "condition_size",
                     "block_b"))
def cvae_forward(kp, x, label, eps, *, inp_size, hidden_size, latent_size,
                 condition_size, block_b=256):
    B = x.shape[0]
    xl = jnp.concatenate([x, label], axis=-1).astype(jnp.float32)
    eps = eps.astype(jnp.float32)

    # Batch tiling: block rounded to sublane multiple; pad batch to a full grid.
    bm = min(block_b, _round_up(B, 8))
    Bp = _round_up(B, bm)
    if Bp != B:
        xl = jnp.pad(xl, ((0, Bp - B), (0, 0)))
        eps = jnp.pad(eps, ((0, Bp - B), (0, 0)))

    bias_offsets, _ = _bias_layout(inp_size, hidden_size, latent_size)
    out_pad = _round_up(inp_size + 3 * latent_size, 128)   # lane-dense output slab

    kernel = functools.partial(
        _cvae_kernel,
        inp_size=inp_size, hidden_size=hidden_size, latent_size=latent_size,
        bias_offsets=bias_offsets, out_pad=out_pad)

    weights = (kp["e_w1"], kp["d_w1l_pad"], kp["e_w2"], kp["e_w3"], kp["e_wmv"],
               kp["d_w1z"], kp["d_w2"], kp["d_w3"], kp["bias_pack"])

    def resident(arr):
        # Full-array block, constant index -> stays in VMEM across grid steps.
        return pl.BlockSpec(arr.shape, lambda i: (0,) * arr.ndim)

    out = pl.pallas_call(
        kernel,
        grid=(Bp // bm,),
        in_specs=[
            pl.BlockSpec((bm, inp_size + condition_size), lambda i: (i, 0)),
            pl.BlockSpec((bm, latent_size), lambda i: (i, 0)),
        ] + [resident(w) for w in weights],
        out_specs=pl.BlockSpec((bm, out_pad), lambda i: (i, 0)),
        out_shape=jax.ShapeDtypeStruct((Bp, out_pad), jnp.float32),
        compiler_params=pltpu.CompilerParams(
            dimension_semantics=("parallel",),
            vmem_limit_bytes=32 * 1024 * 1024),
    )(xl, eps, *weights)

    recon = out[:B, :inp_size]
    mean = out[:B, inp_size:inp_size + latent_size]
    var = out[:B, inp_size + latent_size:inp_size + 2 * latent_size]
    z = out[:B, inp_size + 2 * latent_size:inp_size + 3 * latent_size]
    return recon, mean, var, z


def cvae_forward_ref(lp, x, label, eps):
    """Pure-JAX reference of the PyTorch forward (eval-mode dropout)."""
    xl = jnp.concatenate([x, label], axis=-1)
    h = jnp.maximum(xl @ lp["e_w1"] + lp["e_b1"], 0.0)
    h = jnp.maximum(h @ lp["e_w2"] + lp["e_b2"], 0.0)
    h = jnp.maximum(h @ lp["e_w3"] + lp["e_b3"], 0.0)
    mean = h @ lp["e_wm"] + lp["e_bm"]
    var = h @ lp["e_wv"] + lp["e_bv"]
    z = mean + eps * jnp.exp(0.5 * var)
    zl = jnp.concatenate([z, label], axis=-1)
    d = jnp.maximum(zl @ lp["d_w1"] + lp["d_b1"], 0.0)
    d = jnp.maximum(d @ lp["d_w2"] + lp["d_b2"], 0.0)
    recon = jax.nn.sigmoid(d @ lp["d_w3"] + lp["d_b3"])
    return recon, mean, var, z


if __name__ == "__main__":
    # Small, MNIST-flavored shapes.
    B, INP, HID, LAT, COND = 8, 64, 32, 16, 8

    key = jax.random.PRNGKey(0)
    k_param, k_x, k_label, k_eps = jax.random.split(key, 4)

    lparams = init_cvae_params(k_param, INP, HID, LAT, COND)
    kparams = pack_cvae_params(lparams, INP, HID, LAT, COND)

    x = jax.random.uniform(k_x, (B, INP), jnp.float32)            # flattened image
    label_idx = jax.random.randint(k_label, (B,), 0, COND)
    label = jax.nn.one_hot(label_idx, COND, dtype=jnp.float32)    # condition one-hot
    eps = jax.random.normal(k_eps, (B, LAT), jnp.float32)         # reparam noise
    # TODO(synk): Dropout(0.3)/Dropout(0.2) implemented as identity (eval mode);
    # reparam noise is supplied externally instead of torch.randn_like.

    recon, mean, var, z = jax.block_until_ready(
        cvae_forward(kparams, x, label, eps,
                     inp_size=INP, hidden_size=HID, latent_size=LAT,
                     condition_size=COND))

    recon_r, mean_r, var_r, z_r = cvae_forward_ref(lparams, x, label, eps)
    assert jnp.allclose(recon, recon_r, atol=1e-5, rtol=1e-5)
    assert jnp.allclose(mean, mean_r, atol=1e-5, rtol=1e-5)
    assert jnp.allclose(var, var_r, atol=1e-5, rtol=1e-5)
    assert jnp.allclose(z, z_r, atol=1e-5, rtol=1e-5)

    print("KERNEL_OK")
</pallas_src>

<mosaic_0001>
module attributes {stable_mosaic.version = 11 : i64} {
  func.func @_cvae_kernel(%arg0: i32, %arg1: memref<8x72xf32, #tpu.memory_space<vmem>>, %arg2: memref<8x16xf32, #tpu.memory_space<vmem>>, %arg3: memref<72x32xf32, #tpu.memory_space<vmem>>, %arg4: memref<72x32xf32, #tpu.memory_space<vmem>>, %arg5: memref<32x32xf32, #tpu.memory_space<vmem>>, %arg6: memref<32x32xf32, #tpu.memory_space<vmem>>, %arg7: memref<32x32xf32, #tpu.memory_space<vmem>>, %arg8: memref<16x32xf32, #tpu.memory_space<vmem>>, %arg9: memref<32x32xf32, #tpu.memory_space<vmem>>, %arg10: memref<32x64xf32, #tpu.memory_space<vmem>>, %arg11: memref<1x896xf32, #tpu.memory_space<vmem>>, %arg12: memref<8x128xf32, #tpu.memory_space<vmem>>) attributes {dimension_semantics = [#tpu.dimension_semantics<parallel>], iteration_bounds = array<i64: 1>, scalar_prefetch = 0 : i64, scratch_operands = 0 : i64, tpu.core_type = #tpu.core_type<tc>, window_params = [{transform_indices = @transform_0, window_bounds = array<i64: 8, 72>}, {transform_indices = @transform_1, window_bounds = array<i64: 8, 16>}, {pipeline_mode = #tpu.pipeline_mode<synchronous>, transform_indices = @transform_2, window_bounds = array<i64: 72, 32>}, {pipeline_mode = #tpu.pipeline_mode<synchronous>, transform_indices = @transform_3, window_bounds = array<i64: 72, 32>}, {pipeline_mode = #tpu.pipeline_mode<synchronous>, transform_indices = @transform_4, window_bounds = array<i64: 32, 32>}, {pipeline_mode = #tpu.pipeline_mode<synchronous>, transform_indices = @transform_5, window_bounds = array<i64: 32, 32>}, {pipeline_mode = #tpu.pipeline_mode<synchronous>, transform_indices = @transform_6, window_bounds = array<i64: 32, 32>}, {pipeline_mode = #tpu.pipeline_mode<synchronous>, transform_indices = @transform_7, window_bounds = array<i64: 16, 32>}, {pipeline_mode = #tpu.pipeline_mode<synchronous>, transform_indices = @transform_8, window_bounds = array<i64: 32, 32>}, {pipeline_mode = #tpu.pipeline_mode<synchronous>, transform_indices = @transform_9, window_bounds = array<i64: 32, 64>}, {pipeline_mode = #tpu.pipeline_mode<synchronous>, transform_indices = @transform_10, window_bounds = array<i64: 1, 896>}, {transform_indices = @transform_11, window_bounds = array<i64: 8, 128>}]} {
    %c0 = arith.constant 0 : index
    %c0_0 = arith.constant 0 : index
    %0 = vector.load %arg1[%c0, %c0_0] : memref<8x72xf32, #tpu.memory_space<vmem>>, vector<8x72xf32>
    %c0_1 = arith.constant 0 : index
    %c0_2 = arith.constant 0 : index
    %1 = vector.load %arg2[%c0_1, %c0_2] : memref<8x16xf32, #tpu.memory_space<vmem>>, vector<8x16xf32>
    %c0_3 = arith.constant 0 : index
    %c0_4 = arith.constant 0 : index
    %2 = vector.load %arg3[%c0_3, %c0_4] : memref<72x32xf32, #tpu.memory_space<vmem>>, vector<72x32xf32>
    %cst = arith.constant dense<0.000000e+00> : vector<8x32xf32>
    %3 = tpu.matmul %0, %2, %cst {dimension_numbers = #tpu.dot_dimension_numbers<[1], [0], [0], [1], [0, 0, 1, 1], [], []>} : vector<8x72xf32>, vector<72x32xf32>, vector<8x32xf32> -> vector<8x32xf32>
    %c0_5 = arith.constant 0 : index
    %c0_6 = arith.constant 0 : index
    %4 = vector.load %arg11[%c0_5, %c0_6] : memref<1x896xf32, #tpu.memory_space<vmem>>, vector<1x32xf32>
    %5 = vector.broadcast %4 : vector<1x32xf32> to vector<8x32xf32>
    %6 = arith.addf %3, %5 : vector<8x32xf32>
    %cst_7 = arith.constant 0.000000e+00 : f32
    %7 = vector.broadcast %cst_7 : f32 to vector<8x32xf32>
    %8 = arith.maximumf %6, %7 : vector<8x32xf32>
    %c0_8 = arith.constant 0 : index
    %c0_9 = arith.constant 0 : index
    %9 = vector.load %arg5[%c0_8, %c0_9] : memref<32x32xf32, #tpu.memory_space<vmem>>, vector<32x32xf32>
    %cst_10 = arith.constant dense<0.000000e+00> : vector<8x32xf32>
    %10 = tpu.matmul %8, %9, %cst_10 {dimension_numbers = #tpu.dot_dimension_numbers<[1], [0], [0], [1], [0, 0, 1, 1], [], []>} : vector<8x32xf32>, vector<32x32xf32>, vector<8x32xf32> -> vector<8x32xf32>
    %c0_11 = arith.constant 0 : index
    %c128 = arith.constant 128 : index
    %11 = vector.load %arg11[%c0_11, %c128] : memref<1x896xf32, #tpu.memory_space<vmem>>, vector<1x32xf32>
    %12 = vector.broadcast %11 : vector<1x32xf32> to vector<8x32xf32>
    %13 = arith.addf %10, %12 : vector<8x32xf32>
    %cst_12 = arith.constant 0.000000e+00 : f32
    %14 = vector.broadcast %cst_12 : f32 to vector<8x32xf32>
    %15 = arith.maximumf %13, %14 : vector<8x32xf32>
    %c0_13 = arith.constant 0 : index
    %c0_14 = arith.constant 0 : index
    %16 = vector.load %arg6[%c0_13, %c0_14] : memref<32x32xf32, #tpu.memory_space<vmem>>, vector<32x32xf32>
    %cst_15 = arith.constant dense<0.000000e+00> : vector<8x32xf32>
    %17 = tpu.matmul %15, %16, %cst_15 {dimension_numbers = #tpu.dot_dimension_numbers<[1], [0], [0], [1], [0, 0, 1, 1], [], []>} : vector<8x32xf32>, vector<32x32xf32>, vector<8x32xf32> -> vector<8x32xf32>
    %c0_16 = arith.constant 0 : index
    %c256 = arith.constant 256 : index
    %18 = vector.load %arg11[%c0_16, %c256] : memref<1x896xf32, #tpu.memory_space<vmem>>, vector<1x32xf32>
    %19 = vector.broadcast %18 : vector<1x32xf32> to vector<8x32xf32>
    %20 = arith.addf %17, %19 : vector<8x32xf32>
    %cst_17 = arith.constant 0.000000e+00 : f32
    %21 = vector.broadcast %cst_17 : f32 to vector<8x32xf32>
    %22 = arith.maximumf %20, %21 : vector<8x32xf32>
    %c0_18 = arith.constant 0 : index
    %c0_19 = arith.constant 0 : index
    %23 = vector.load %arg7[%c0_18, %c0_19] : memref<32x32xf32, #tpu.memory_space<vmem>>, vector<32x32xf32>
    %cst_20 = arith.constant dense<0.000000e+00> : vector<8x32xf32>
    %24 = tpu.matmul %22, %23, %cst_20 {dimension_numbers = #tpu.dot_dimension_numbers<[1], [0], [0], [1], [0, 0, 1, 1], [], []>} : vector<8x32xf32>, vector<32x32xf32>, vector<8x32xf32> -> vector<8x32xf32>
    %c0_21 = arith.constant 0 : index
    %c384 = arith.constant 384 : index
    %25 = vector.load %arg11[%c0_21, %c384] : memref<1x896xf32, #tpu.memory_space<vmem>>, vector<1x32xf32>
    %26 = vector.broadcast %25 : vector<1x32xf32> to vector<8x32xf32>
    %27 = arith.addf %24, %26 : vector<8x32xf32>
    %28 = vector.extract_strided_slice %27 {offsets = [0, 0], sizes = [8, 16], strides = [1, 1]} : vector<8x32xf32> to vector<8x16xf32>
    %29 = vector.extract_strided_slice %27 {offsets = [0, 16], sizes = [8, 16], strides = [1, 1]} : vector<8x32xf32> to vector<8x16xf32>
    %cst_22 = arith.constant 5.000000e-01 : f32
    %30 = vector.broadcast %cst_22 : f32 to vector<8x16xf32>
    %31 = arith.mulf %30, %29 : vector<8x16xf32>
    %32 = math.exp %31 : vector<8x16xf32>
    %33 = arith.mulf %1, %32 : vector<8x16xf32>
    %34 = arith.addf %28, %33 : vector<8x16xf32>
    %c0_23 = arith.constant 0 : index
    %c0_24 = arith.constant 0 : index
    %35 = vector.load %arg8[%c0_23, %c0_24] : memref<16x32xf32, #tpu.memory_space<vmem>>, vector<16x32xf32>
    %cst_25 = arith.constant dense<0.000000e+00> : vector<8x32xf32>
    %36 = tpu.matmul %34, %35, %cst_25 {dimension_numbers = #tpu.dot_dimension_numbers<[1], [0], [0], [1], [0, 0, 1, 1], [], []>} : vector<8x16xf32>, vector<16x32xf32>, vector<8x32xf32> -> vector<8x32xf32>
    %c0_26 = arith.constant 0 : index
    %c0_27 = arith.constant 0 : index
    %37 = vector.load %arg4[%c0_26, %c0_27] : memref<72x32xf32, #tpu.memory_space<vmem>>, vector<72x32xf32>
    %cst_28 = arith.constant dense<0.000000e+00> : vector<8x32xf32>
    %38 = tpu.matmul %0, %37, %cst_28 {dimension_numbers = #tpu.dot_dimension_numbers<[1], [0], [0], [1], [0, 0, 1, 1], [], []>} : vector<8x72xf32>, vector<72x32xf32>, vector<8x32xf32> -> vector<8x32xf32>
    %39 = arith.addf %36, %38 : vector<8x32xf32>
    %c0_29 = arith.constant 0 : index
    %c512 = arith.constant 512 : index
    %40 = vector.load %arg11[%c0_29, %c512] : memref<1x896xf32, #tpu.memory_space<vmem>>, vector<1x32xf32>
    %41 = vector.broadcast %40 : vector<1x32xf32> to vector<8x32xf32>
    %42 = arith.addf %39, %41 : vector<8x32xf32>
    %cst_30 = arith.constant 0.000000e+00 : f32
    %43 = vector.broadcast %cst_30 : f32 to vector<8x32xf32>
    %44 = arith.maximumf %42, %43 : vector<8x32xf32>
    %c0_31 = arith.constant 0 : index
    %c0_32 = arith.constant 0 : index
    %45 = vector.load %arg9[%c0_31, %c0_32] : memref<32x32xf32, #tpu.memory_space<vmem>>, vector<32x32xf32>
    %cst_33 = arith.constant dense<0.000000e+00> : vector<8x32xf32>
    %46 = tpu.matmul %44, %45, %cst_33 {dimension_numbers = #tpu.dot_dimension_numbers<[1], [0], [0], [1], [0, 0, 1, 1], [], []>} : vector<8x32xf32>, vector<32x32xf32>, vector<8x32xf32> -> vector<8x32xf32>
    %c0_34 = arith.constant 0 : index
    %c640 = arith.constant 640 : index
    %47 = vector.load %arg11[%c0_34, %c640] : memref<1x896xf32, #tpu.memory_space<vmem>>, vector<1x32xf32>
    %48 = vector.broadcast %47 : vector<1x32xf32> to vector<8x32xf32>
    %49 = arith.addf %46, %48 : vector<8x32xf32>
    %cst_35 = arith.constant 0.000000e+00 : f32
    %50 = vector.broadcast %cst_35 : f32 to vector<8x32xf32>
    %51 = arith.maximumf %49, %50 : vector<8x32xf32>
    %c0_36 = arith.constant 0 : index
    %c0_37 = arith.constant 0 : index
    %52 = vector.load %arg10[%c0_36, %c0_37] : memref<32x64xf32, #tpu.memory_space<vmem>>, vector<32x64xf32>
    %cst_38 = arith.constant dense<0.000000e+00> : vector<8x64xf32>
    %53 = tpu.matmul %51, %52, %cst_38 {dimension_numbers = #tpu.dot_dimension_numbers<[1], [0], [0], [1], [0, 0, 1, 1], [], []>} : vector<8x32xf32>, vector<32x64xf32>, vector<8x64xf32> -> vector<8x64xf32>
    %c0_39 = arith.constant 0 : index
    %c768 = arith.constant 768 : index
    %54 = vector.load %arg11[%c0_39, %c768] : memref<1x896xf32, #tpu.memory_space<vmem>>, vector<1x64xf32>
    %55 = vector.broadcast %54 : vector<1x64xf32> to vector<8x64xf32>
    %56 = arith.addf %53, %55 : vector<8x64xf32>
    %57 = arith.negf %56 : vector<8x64xf32>
    %58 = math.exp %57 : vector<8x64xf32>
    %cst_40 = arith.constant 1.000000e+00 : f32
    %59 = vector.broadcast %cst_40 : f32 to vector<8x64xf32>
    %60 = arith.addf %59, %58 : vector<8x64xf32>
    %61 = arith.divf %59, %60 : vector<8x64xf32>
    %cst_41 = arith.constant 0.000000e+00 : f32
    %62 = vector.broadcast %cst_41 : f32 to vector<8x16xf32>
    %63 = tpu.concatenate %61, %28, %29, %34, %62 in 1 : vector<8x64xf32>, vector<8x16xf32>, vector<8x16xf32>, vector<8x16xf32>, vector<8x16xf32> -> vector<8x128xf32>
    %c0_42 = arith.constant 0 : index
    %c0_43 = arith.constant 0 : index
    %64 = vector.load %arg12[%c0_42, %c0_43] : memref<8x128xf32, #tpu.memory_space<vmem>>, vector<8x128xf32>
    tpu.vector_store %arg12[%c0_42, %c0_43], %63 {strides = array<i32>} : memref<8x128xf32, #tpu.memory_space<vmem>>, vector<8x128xf32>,
    return
  }
  func.func @transform_0(%arg0: i32) -> (i32, i32) {
    %c0_i32 = arith.constant 0 : i32
    %c0_i32_0 = arith.constant 0 : i32
    return %arg0, %c0_i32 : i32, i32
  }
  func.func @transform_1(%arg0: i32) -> (i32, i32) {
    %c0_i32 = arith.constant 0 : i32
    %c0_i32_0 = arith.constant 0 : i32
    return %arg0, %c0_i32 : i32, i32
  }
  func.func @transform_2(%arg0: i32) -> (i32, i32) {
    %c0_i32 = arith.constant 0 : i32
    %c0_i32_0 = arith.constant 0 : i32
    %c0_i32_1 = arith.constant 0 : i32
    return %c0_i32, %c0_i32_0 : i32, i32
  }
  func.func @transform_3(%arg0: i32) -> (i32, i32) {
    %c0_i32 = arith.constant 0 : i32
    %c0_i32_0 = arith.constant 0 : i32
    %c0_i32_1 = arith.constant 0 : i32
    return %c0_i32, %c0_i32_0 : i32, i32
  }
  func.func @transform_4(%arg0: i32) -> (i32, i32) {
    %c0_i32 = arith.constant 0 : i32
    %c0_i32_0 = arith.constant 0 : i32
    %c0_i32_1 = arith.constant 0 : i32
    return %c0_i32, %c0_i32_0 : i32, i32
  }
  func.func @transform_5(%arg0: i32) -> (i32, i32) {
    %c0_i32 = arith.constant 0 : i32
    %c0_i32_0 = arith.constant 0 : i32
    %c0_i32_1 = arith.constant 0 : i32
    return %c0_i32, %c0_i32_0 : i32, i32
  }
  func.func @transform_6(%arg0: i32) -> (i32, i32) {
    %c0_i32 = arith.constant 0 : i32
    %c0_i32_0 = arith.constant 0 : i32
    %c0_i32_1 = arith.constant 0 : i32
    return %c0_i32, %c0_i32_0 : i32, i32
  }
  func.func @transform_7(%arg0: i32) -> (i32, i32) {
    %c0_i32 = arith.constant 0 : i32
    %c0_i32_0 = arith.constant 0 : i32
    %c0_i32_1 = arith.constant 0 : i32
    return %c0_i32, %c0_i32_0 : i32, i32
  }
  func.func @transform_8(%arg0: i32) -> (i32, i32) {
    %c0_i32 = arith.constant 0 : i32
    %c0_i32_0 = arith.constant 0 : i32
    %c0_i32_1 = arith.constant 0 : i32
    return %c0_i32, %c0_i32_0 : i32, i32
  }
  func.func @transform_9(%arg0: i32) -> (i32, i32) {
    %c0_i32 = arith.constant 0 : i32
    %c0_i32_0 = arith.constant 0 : i32
    %c0_i32_1 = arith.constant 0 : i32
    return %c0_i32, %c0_i32_0 : i32, i32
  }
  func.func @transform_10(%arg0: i32) -> (i32, i32) {
    %c0_i32 = arith.constant 0 : i32
    %c0_i32_0 = arith.constant 0 : i32
    %c0_i32_1 = arith.constant 0 : i32
    return %c0_i32, %c0_i32_0 : i32, i32
  }
  func.func @transform_11(%arg0: i32) -> (i32, i32) {
    %c0_i32 = arith.constant 0 : i32
    %c0_i32_0 = arith.constant 0 : i32
    return %arg0, %c0_i32 : i32, i32
  }
}

</mosaic_0001>

<bundles_post_ra>
// kernel: cvae_forward.1
= control target key start
LH: loop header
LB: loop body
LE: loop exit
PB: predicated region body
PF: predicated region fallthrough
CT: control target
= control target key end

     0   :  { %v991_v0 = vmov 0.0|0.0   ;;  %vm992_vm0 = vmmov 0   ;;  %v993_v4 = vmov 0.0   ;;  %vm56_vm1 = vcmask 588800   ;;  %s995_s24 = smov 64   ;;  %s1255_s2 = inlined_call_operand.vmem [shape: f32[72,32], index: 2, kind: input, shape index: {}]   ;;  %s1256_s4 = inlined_call_operand.vmem [shape: f32[32,32], index: 4, kind: input, shape index: {}]   ;;  %s1257_s0 = inlined_call_operand.vmem [shape: f32[8,72], index: 0, kind: input, shape index: {}]   ;;  %s1258_s10 = inlined_call_operand.vmem [shape: f32[1,896], index: 10, kind: input, shape index: {}]   ;;  %s1259_s5 = inlined_call_operand.vmem [shape: f32[32,32], index: 5, kind: input, shape index: {}]   ;;  %s1260_s6 = inlined_call_operand.vmem [shape: f32[32,32], index: 6, kind: input, shape index: {}]   ;;  %s1261_s3 = inlined_call_operand.vmem [shape: f32[72,32], index: 3, kind: input, shape index: {}]   ;;  %s1262_s7 = inlined_call_operand.vmem [shape: f32[16,32], index: 7, kind: input, shape index: {}]   ;;  %s1263_s1 = inlined_call_operand.vmem [shape: f32[8,16], index: 1, kind: input, shape index: {}]   ;;  %s1264_s8 = inlined_call_operand.vmem [shape: f32[32,32], index: 8, kind: input, shape index: {}]   ;;  %s1265_s9 = inlined_call_operand.vmem [shape: f32[32,64], index: 9, kind: input, shape index: {}]   ;;  %s1266_s11 = inlined_call_operand.vmem [shape: f32[8,128], index: 11, kind: output, shape index: {}]  }
   0x1   :  { %922 = vmatprep.subr.bf16.mxu0 %v991_v0  ;;  %v40_v1 = vld [vmem:[%s1255_s2] sm:$0xff]  ;;  %v41_v2 = vld [vmem:[%s1255_s2 + $0x8] sm:$0xff]  ;;  %v42_v3 = vld [vmem:[%s1255_s2 + $0x10] sm:$0xff]  ;;  %836 = vmatprep.mubr.msk.f32.mxu0 %vm992_vm0, %v993_v4  ;;  %vm142_vm2 = vcmask 261120   ;;  %vm476_vm3 = vcmask 130048   ;;  %vm741_vm4 = vcmask 523264  }
   0x2   :  { %v923_v5 = vpack.c.bf16 %v41_v2, %v40_v1  ;;  %v43_v6 = vld [vmem:[%s1255_s2 + $0x18] sm:$0xff]  ;;  %934 = vmatprep.subr.bf16.mxu1 %v991_v0  ;;  %847 = vmatprep.mubr.msk.f32.mxu1 %vm992_vm0, %v993_v4  ;;  %v131_v8 = vld [vmem:[%s1256_s4] sm:$0xff]  ;;  %v132_v9 = vld [vmem:[%s1256_s4 + $0x8] sm:$0xff]  ;;  %vm743_vm5 = vcmask 654336   ;;  %vm745_vm6 = vcmask 785408   ;;  %vm747_vm7 = vcmask 916480  }
   0x3   :  { %v926_v7 = vpack.c.bf16 %v43_v6, %v42_v3  ;;  %v44_v10 = vld [vmem:[%s1255_s2 + $0x20] sm:$0xff]  ;;  %v45_v11 = vld [vmem:[%s1255_s2 + $0x28] sm:$0xff]  ;;  %v935_v12 = vpack.c.bf16 %v132_v9, %v131_v8  ;;  %v46_v14 = vld [vmem:[%s1255_s2 + $0x30] sm:$0xff] }
   0x4   :  { %924 = vmatpush3.bf16.msra.mxu0 %v923_v5  ;;  %v929_v13 = vpack.c.bf16 %v45_v11, %v44_v10  ;;  %v47_v15 = vld [vmem:[%s1255_s2 + $0x38] sm:$0xff]  ;;  %v48_v17 = vld [vmem:[%s1255_s2 + $0x40] sm:$0xff]  ;;  %v133_v19 = vld [vmem:[%s1256_s4 + $0x10] sm:$0xff] }
   0x5   :  { %925 = vmatprep.subr.bf16.mxu0 %v991_v0  ;;  %936 = vmatpush3.bf16.msra.mxu1 %v935_v12  ;;  %v932_v16 = vpack.c.bf16 %v47_v15, %v46_v14  ;;  %v1104_v18 = vld [vmem:[%s1257_s0] sm:$0xff]  ;;  %v134_v20 = vld [vmem:[%s1256_s4 + $0x18] sm:$0xff]  ;;  %v218_v24 = vld [vmem:[%s1259_s5 + $0x8] sm:$0xff] }
   0x6   :  { %937 = vmatprep.subr.bf16.mxu1 %v991_v0  ;;  %v938_v21 = vpack.c.bf16 %v134_v20, %v133_v19  ;;  %v754_v22 = vld [vmem:[%s1258_s10] ss:$0 sm:$0xff]  ;;  %v219_v30 = vld [vmem:[%s1259_s5 + $0x10] sm:$0xff]  ;;  %v220_v31 = vld [vmem:[%s1259_s5 + $0x18] sm:$0xff] }
   0x7   :  { %v217_v23 = vld [vmem:[%s1259_s5] sm:$0xff]  ;;  %v944_v32 = vpack.c.bf16 %v220_v31, %v219_v30  ;;  %v303_v35 = vld [vmem:[%s1260_s6 + $0x8] sm:$0xff]  ;;  %v304_v41 = vld [vmem:[%s1260_s6 + $0x10] sm:$0xff] }
   0x8   :  { %927 = vmatpush3.bf16.msra.mxu0 %v926_v7  ;;  %v941_v28 = vpack.c.bf16 %v218_v24, %v217_v23  ;;  %v756_v33 = vld [vmem:[%s1258_s10 + $0x1] ss:$0 sm:$0xff]  ;;  %v305_v42 = vld [vmem:[%s1260_s6 + $0x18] sm:$0xff]  ;;  %v758_v44 = vld [vmem:[%s1258_s10 + $0x2] ss:$0 sm:$0xff] }
   0x9   :  { %928 = vmatprep.subr.bf16.mxu0 %v991_v0  ;;  %939 = vmatpush3.bf16.msra.mxu1 %v938_v21  ;;  %v302_v34 = vld [vmem:[%s1260_s6] sm:$0xff]  ;;  %v950_v43 = vpack.c.bf16 %v305_v42, %v304_v41  ;;  %v398_v50 = vld [vmem:[%s1261_s3 + $0x8] sm:$0xff]  ;;  %v399_v51 = vld [vmem:[%s1261_s3 + $0x10] sm:$0xff]  ;;  %s996_s6 = smov 96  }
   0xa   :  { %940 = vmatprep.subr.bf16.mxu1 %v991_v0  ;;  %v947_v39 = vpack.c.bf16 %v303_v35, %v302_v34  ;;  %v397_v49 = vld [vmem:[%s1261_s3] sm:$0xff]  ;;  %v400_v53 = vld [vmem:[%s1261_s3 + $0x18] sm:$0xff]  ;;  %v402_v56 = vld [vmem:[%s1261_s3 + $0x28] sm:$0xff] }
   0xb   :  { %v953_v52 = vpack.c.bf16 %v398_v50, %v397_v49  ;;  %v956_v54 = vpack.c.bf16 %v400_v53, %v399_v51  ;;  %v401_v55 = vld [vmem:[%s1261_s3 + $0x20] sm:$0xff]  ;;  %v403_v58 = vld [vmem:[%s1261_s3 + $0x30] sm:$0xff]  ;;  %v404_v59 = vld [vmem:[%s1261_s3 + $0x38] sm:$0xff] }
   0xc   :  { %930 = vmatpush3.bf16.msra.mxu0 %v929_v13  ;;  %v959_v57 = vpack.c.bf16 %v402_v56, %v401_v55  ;;  %v962_v60 = vpack.c.bf16 %v404_v59, %v403_v58  ;;  %v760_v61 = vld [vmem:[%s1258_s10 + $0x3] ss:$0 sm:$0xff]  ;;  %v396_v5 = vld [vmem:[%s1262_s7 + $0x8] sm:$0xff]  ;;  %v561_v19 = vld [vmem:[%s1264_s8 + $0x10] sm:$0xff] }
   0xd   :  { %931 = vmatprep.subr.bf16.mxu0 %v991_v0  ;;  %v395_v3 = vld [vmem:[%s1262_s7] sm:$0xff]  ;;  %s994_s7 = smov 112   ;;  %v560_v15 = vld [vmem:[%s1264_s8 + $0x8] sm:$0xff]  ;;  %v646_v30 = vld [vmem:[%s1265_s9 + $0x10] sm:$0xff] }
   0xe   :  { %v965_v6 = vpack.c.bf16 %v396_v5, %v395_v3  ;;  %v405_v8 = vld [vmem:[%s1261_s3 + $0x40] sm:$0xff]  ;;  %v647_v31 = vld [vmem:[%s1265_s9 + $0x18] sm:$0xff] }
   0xf   :  { %v39_v10 = vld [vmem:[%s1263_s1] sm:$0xff] }
  0x10   :  { %933 = vmatpush3.bf16.msra.mxu0 %v932_v16  ;;  %v559_v14 = vld [vmem:[%s1264_s8] sm:$0xff] }
  0x11   :  { %834 = vmatprep.subr.mxu0 %v993_v4  ;;  %v644_v21 = vld [vmem:[%s1265_s9] sm:$0xff] }
  0x14   :  { %835 = vmatpush3.msra.mxu0 %v48_v17  ;;  %v968_v17 = vpack.c.bf16 %v560_v15, %v559_v14 }
  0x15   :  { %837 = vmatmul.mubr.msk.f32.vlgmr.msra.gmra.mrb[0].mxu0 %vm56_vm1, %v1104_v18  ;;  %952 = vmatprep.subr.bf16.mxu0 %v991_v0 }
  0x16   :  { %890 = vmatprep.mubr.msk.f32.mxu0 %vm992_vm0, %v993_v4  ;;  %954 = vmatpush3.bf16.msra.mxu0 %v953_v52 }
  0x17   :  { %955 = vmatprep.subr.bf16.mxu0 %v991_v0 }
  0x1a   :  { %957 = vmatpush3.bf16.msra.mxu0 %v956_v54 }
  0x1b   :  { %958 = vmatprep.subr.bf16.mxu0 %v991_v0 }
  0x1e   :  { %960 = vmatpush3.bf16.msra.mxu0 %v959_v57 }
  0x1f   :  { %961 = vmatprep.subr.bf16.mxu0 %v991_v0 }
  0x22   :  { %963 = vmatpush3.bf16.msra.mxu0 %v962_v60 }
  0x23   :  { %888 = vmatprep.subr.mxu0 %v993_v4 }
  0x26   :  { %889 = vmatpush3.msra.mxu0 %v405_v8 }
  0x27   :  { %891 = vmatmul.mubr.msk.f32.vlgmr.msra.gmra.mrb[2].mxu0 %vm56_vm1, %v1104_v18  ;;  %973 = vmatprep.subr.bf16.mxu0 %v991_v0 }
  0x28   :  { %919 = vmatprep.mubr.msk.f32.mxu0 %vm992_vm0, %v993_v4 }
  0xe8   :  { %v126_v25 = vpop.f32.mrb[0].mxu0 }
  0xe9   :  { %v127_v26 = vadd.f32 %v754_v22, %v126_v25  ;;  %v838_v27 = vpop.f32.mrb[1].mxu0  ;;  %v645_v22 = vld [vmem:[%s1265_s9 + $0x8] sm:$0xff]  ;;  %v764_v25 = vld [vmem:[%s1258_s10 + $0x4] ss:$0 sm:$0xff] }
  0xea   :  { %v974_v23 = vpack.c.bf16 %v645_v22, %v644_v21 }
  0xeb   :  { %v130_v29 = vmax.f32 %v127_v26, 0.0 }
  0xec   :  { %975 = vmatpush3.bf16.msra.mxu0 %v974_v23 }
  0xed   :  { %848 = vmatmul.mubr.msk.f32.vlgmr.msra.gmra.mrb[0].mxu1 %vm142_vm2, %v130_v29  ;;  %976 = vmatprep.subr.bf16.mxu0 %v991_v0 }
  0xee   :  { %942 = vmatpush3.bf16.msra.mxu1 %v941_v28  ;;  %858 = vmatprep.mubr.msk.f32.mxu1 %vm992_vm0, %v993_v4 }
  0xef   :  { %943 = vmatprep.subr.bf16.mxu1 %v991_v0 }
  0xf2   :  { %945 = vmatpush3.bf16.msra.mxu1 %v944_v32  ;;  %v765_v32 = vld [vmem:[%s1258_s10 + $0x5] ss:$0 sm:$0xff] }
  0xf3   :  { %946 = vmatprep.subr.bf16.mxu1 %v991_v0 }
  0xfa   :  { %v472_v16 = vpop.f32.mrb[2].mxu0 }
  0xfb   :  { %v892_v18 = vpop.f32.mrb[3].mxu0 }
 0x1c0   :  { %v212_v36 = vpop.f32.mrb[0].mxu1 }
 0x1c1   :  { %v213_v37 = vadd.f32 %v756_v33, %v212_v36  ;;  %v849_v38 = vpop.f32.mrb[1].mxu1 }
 0x1c3   :  { %v216_v40 = vmax.f32 %v213_v37, 0.0  ;;  %v767_v37 = vld [vmem:[%s1258_s10 + $0x6] ss:$0 sm:$0xff] }
 0x1c5   :  { %859 = vmatmul.mubr.msk.f32.vlgmr.msra.gmra.mrb[2].mxu1 %vm142_vm2, %v216_v40 }
 0x1c6   :  { %948 = vmatpush3.bf16.msra.mxu1 %v947_v39  ;;  %869 = vmatprep.mubr.msk.f32.mxu1 %vm992_vm0, %v993_v4 }
 0x1c7   :  { %949 = vmatprep.subr.bf16.mxu1 %v991_v0 }
 0x1ca   :  { %951 = vmatpush3.bf16.msra.mxu1 %v950_v43 }
 0x1cb   :  { %964 = vmatprep.subr.bf16.mxu1 %v991_v0 }
 0x298   :  { %v297_v45 = vpop.f32.mrb[2].mxu1 }
 0x299   :  { %v298_v46 = vadd.f32 %v758_v44, %v297_v45  ;;  %v860_v47 = vpop.f32.mrb[3].mxu1 }
 0x29b   :  { %v301_v48 = vmax.f32 %v298_v46, 0.0 }
 0x29d   :  { %870 = vmatmul.mubr.msk.f32.vlgmr.msra.gmra.mrb[4].mxu1 %vm142_vm2, %v301_v48 }
 0x29e   :  { %897 = vmatprep.mubr.msk.f32.mxu1 %vm992_vm0, %v993_v4  ;;  %966 = vmatpush3.bf16.msra.mxu1 %v965_v6 }
 0x29f   :  { %967 = vmatprep.subr.bf16.mxu1 %v991_v0 }
 0x370   :  { %v382_v62 = vpop.f32.mrb[4].mxu1 }
 0x371   :  { %v383_v63 = vadd.f32 %v760_v61, %v382_v62  ;;  %v871_v1 = vpop.f32.mrb[5].mxu1 }
 0x373   :  { %v386_v2 = vmul.f32 0.5, %v383_v63 }
 0x375   :  { %v387_v7 = vmul.f32 1.442695, %v386_v2 }
 0x377   :  { %985 = vpow2.f32 %v387_v7 }
 0x381   :  { %v986_v9 = vpop.eup %985 }
 0x382   :  { %390 = vrot.lane.b32.xlu0 %v986_v9, %s994_s7 }
 0x386   :  { %735 = vrot.lane.b32.xlu0 %v383_v63, %s995_s24 }
 0x3f4   :  { %v391_v11 = vpop.permute.xlu0 %390 }
 0x3f5   :  { %v393_v12 = vmul.f32 %v391_v11, %v39_v10 }
 0x3f7   :  { %v394_v13 = vadd.f32 %v393_v12, %v383_v63 }
 0x3f8   :  { %v736_v45 = vpop.permute.xlu0 %735 }
 0x3f9   :  { %738 = vrot.lane.b32.xlu1 %v394_v13, %s996_s6  ;;  %898 = vmatmul.mubr.msk.f32.vlgmr.msra.gmra.mrb[6].mxu1 %vm476_vm3, %v394_v13 }
 0x3fa   :  { %908 = vmatprep.mubr.msk.f32.mxu1 %vm992_vm0, %v993_v4  ;;  %969 = vmatpush3.bf16.msra.mxu1 %v968_v17  ;;  %v562_v4 = vld [vmem:[%s1264_s8 + $0x18] sm:$0xff] }
 0x3fb   :  { %970 = vmatprep.subr.bf16.mxu1 %v991_v0  ;;  %v971_v20 = vpack.c.bf16 %v562_v4, %v561_v19  ;;  %v977_v0 = vpack.c.bf16 %v647_v31, %v646_v30 }
 0x3fd   :  { %978 = vmatpush3.bf16.msra.mxu0 %v977_v0 }
 0x3fe   :  { %972 = vmatpush3.bf16.msra.mxu1 %v971_v20 }
 0x46b   :  { %v739_v47 = vpop.permute.xlu1 %738 }
 0x4cc   :  { %v546_v24 = vpop.f32.mrb[6].mxu1 }
 0x4cd   :  { %v547_v26 = vadd.f32 %v546_v24, %v472_v16  ;;  %v899_v27 = vpop.f32.mrb[7].mxu1 }
 0x4cf   :  { %v557_v28 = vadd.f32 %v764_v25, %v547_v26 }
 0x4d1   :  { %v558_v29 = vmax.f32 %v557_v28, 0.0 }
 0x4d3   :  { %909 = vmatmul.mubr.msk.f32.vlgmr.msra.gmra.mrb[8].mxu1 %vm142_vm2, %v558_v29 }
 0x5a6   :  { %v639_v33 = vpop.f32.mrb[8].mxu1 }
 0x5a7   :  { %v640_v34 = vadd.f32 %v765_v32, %v639_v33  ;;  %v910_v35 = vpop.f32.mrb[9].mxu1 }
 0x5a9   :  { %v643_v36 = vmax.f32 %v640_v34, 0.0 }
 0x5ab   :  { %920 = vmatmul.mubr.msk.f32.vlgmr.msra.gmra.mrb[4].mxu0 %vm142_vm2, %v643_v36 }
 0x67e   :  { %v724_v38 = vpop.f32.mrb[4].mxu0 }
 0x67f   :  { %v725_v39 = vadd.f32 %v767_v37, %v724_v38  ;;  %v921_v40 = vpop.f32.mrb[5].mxu0 }
 0x681   :  { %v769_v41 = vmul.f32 -1.442695, %v725_v39 }
 0x683   :  { %987 = vpow2.f32 %v769_v41 }
 0x68d   :  { %v988_v42 = vpop.eup %987 }
 0x68e   :  { %v731_v43 = vadd.f32 1.0, %v988_v42 }
 0x690   :  { %989 = vrcp.f32 %v731_v43 }
 0x69a   :  { %v990_v44 = vpop.eup %989 }
 0x69b   :  { %v742_v46 = vsel %vm741_vm4, %v990_v44, %v736_v45 }
 0x69c   :  { %v744_v48 = vsel %vm743_vm5, %v742_v46, %v736_v45 }
 0x69d   :  { %v746_v49 = vsel %vm745_vm6, %v744_v48, %v739_v47 }
 0x69e   :  { %v748_v50 = vsel %vm747_vm7, %v746_v49, 0.0 }
 0x69f   :  { %749 = vst [vmem:[%s1266_s11] sm:$0xff] %v748_v50 }

</bundles_post_ra>
